<compile_context>
chip_gen: v7x
topology: tpu7x:2x2x1
jax: 0.10.0
libtpu: 0.0.40
codegen_flags: <defaults>
</compile_context>

<pallas_src>
import jax
import jax.numpy as jnp
from jax.experimental import pallas as pl
from jax.experimental.pallas import tpu as pltpu

_EPS = 1e-5


def _round_up(n, m):
    return -(-n // m) * m


def _make_ln_kernel(with_bias: bool, inv_c: float):
    """Kernel over a (C, TILE_HW) tile: normalize each lane column over C."""

    def _moments(x):
        mu = jnp.sum(x, axis=0, keepdims=True) * inv_c          # (1, T)
        d = x - mu                                               # (C, T)
        var = jnp.sum(d * d, axis=0, keepdims=True) * inv_c      # (1, T)
        inv = jax.lax.rsqrt(var + _EPS)                          # (1, T)
        return d, inv

    if with_bias:
        def kernel(x_ref, w_ref, b_ref, o_ref):
            x = x_ref[...].astype(jnp.float32)                   # (C, T)
            d, inv = _moments(x)
            w = w_ref[...].astype(jnp.float32)                   # (C, 1)
            b = b_ref[...].astype(jnp.float32)                   # (C, 1)
            o_ref[...] = ((d * inv) * w + b).astype(o_ref.dtype)
    else:
        def kernel(x_ref, w_ref, o_ref):
            x = x_ref[...].astype(jnp.float32)                   # (C, T)
            _, inv = _moments(x)
            w = w_ref[...].astype(jnp.float32)                   # (C, 1)
            # BiasFree uses centered variance but does NOT subtract the mean.
            o_ref[...] = (x * (inv * w)).astype(o_ref.dtype)

    return kernel


def _choose_tile_hw(batch, hw, c, in_itemsize, out_itemsize):
    """Pick the lane-tile size (multiple of 128) and an explicit VMEM limit."""
    try:
        vmem_cap = int(pltpu.get_tpu_info().vmem_capacity_bytes)
    except Exception:  # pragma: no cover - conservative fallback (v7x-sized)
        vmem_cap = 64 * 1024 * 1024

    # Per lane-column bytes: double-buffered input + output tiles plus ~3 live
    # full-tile f32 temporaries (x_f32, d, out) inside the body.
    per_col = c * (2 * in_itemsize + 2 * out_itemsize + 3 * 4) + 8 * 4
    budget = int(vmem_cap * 0.55)
    max_tile = max(128, (budget // per_col) // 128 * 128)

    hw_ceil = _round_up(hw, 128)
    tile = min(max_tile, hw_ceil, 32 * 1024)

    # Prefer >= 8 total grid steps (v7x: 2 TCs x >=4 steps each for pipelining)
    # when the tensor is big enough that each step still moves a healthy burst.
    if batch * pl.cdiv(hw_ceil, tile) < 8:
        per_batch = -(-8 // max(1, batch))
        cand = _round_up(pl.cdiv(hw_ceil, per_batch), 128)
        if cand >= 2048:
            tile = min(tile, cand)

    est_bytes = per_col * tile + 4 * c * 4
    vmem_limit = int(min(vmem_cap, max(2 * est_bytes, 32 * 1024 * 1024)))
    return tile, vmem_limit


def layernorm2(x, weight, bias=None, layer_norm_type="BiasFree"):
    """Pallas LayerNorm2: per-pixel LayerNorm over C for an NCHW tensor."""
    b, c, h, w = x.shape
    hw = h * w
    with_bias = layer_norm_type != "BiasFree"
    if with_bias and bias is None:
        bias = jnp.zeros((c,), jnp.float32)

    # Free, transpose-less reshape: normalization groups become lane columns.
    x3 = x.reshape(b, c, hw)
    out_dtype = x.dtype

    tile, vmem_limit = _choose_tile_hw(b, hw, c, x.dtype.itemsize, out_dtype.itemsize)
    grid = (b, pl.cdiv(hw, tile))

    operands = [x3, weight.reshape(c, 1)]
    in_specs = [
        pl.BlockSpec((None, c, tile), lambda i, j: (i, 0, j)),
        pl.BlockSpec((c, 1), lambda i, j: (0, 0)),
    ]
    if with_bias:
        operands.append(bias.reshape(c, 1))
        in_specs.append(pl.BlockSpec((c, 1), lambda i, j: (0, 0)))

    kernel = _make_ln_kernel(with_bias, 1.0 / c)

    out = pl.pallas_call(
        kernel,
        out_shape=jax.ShapeDtypeStruct((b, c, hw), out_dtype),
        grid_spec=pltpu.PrefetchScalarGridSpec(
            num_scalar_prefetch=0,
            grid=grid,
            in_specs=in_specs,
            out_specs=pl.BlockSpec((None, c, tile), lambda i, j: (i, 0, j)),
        ),
        compiler_params=pltpu.CompilerParams(
            dimension_semantics=("parallel", "parallel"),
            vmem_limit_bytes=vmem_limit,
        ),
    )(*operands)

    return out.reshape(b, c, h, w)


def _reference_ln2(x, weight, bias, ln_type):
    b, c, h, w = x.shape
    x3 = jnp.transpose(x, (0, 2, 3, 1)).reshape(b, h * w, c).astype(jnp.float32)
    mu = jnp.mean(x3, axis=-1, keepdims=True)
    var = jnp.var(x3, axis=-1, keepdims=True)  # unbiased=False
    if ln_type == "BiasFree":
        y = x3 / jnp.sqrt(var + _EPS) * weight.astype(jnp.float32)
    else:
        y = (x3 - mu) / jnp.sqrt(var + _EPS) * weight.astype(jnp.float32) + bias.astype(jnp.float32)
    return jnp.transpose(y.reshape(b, h, w, c), (0, 3, 1, 2)).astype(x.dtype)


if __name__ == "__main__":
    key = jax.random.PRNGKey(0)
    k1, k2, k3, k4, k5 = jax.random.split(key, 5)

    # Case 1: BiasFree LayerNorm2(channel=4), x (2, 4, 16, 16)
    B, C, H, W = 2, 4, 16, 16
    x = jax.random.normal(k1, (B, C, H, W), dtype=jnp.float32)
    w = jnp.ones((C,), jnp.float32)  # nn.Parameter(torch.ones(C))
    y = jax.block_until_ready(layernorm2(x, w, layer_norm_type="BiasFree"))
    y_ref = _reference_ln2(x, w, None, "BiasFree")
    assert y.shape == x.shape and y.dtype == x.dtype
    assert jnp.allclose(y, y_ref, atol=1e-4, rtol=1e-4), float(jnp.max(jnp.abs(y - y_ref)))

    # Case 2: WithBias variant, same shape, non-trivial weight/bias
    w2 = 1.0 + 0.1 * jax.random.normal(k2, (C,), dtype=jnp.float32)
    b2 = 0.1 * jax.random.normal(k3, (C,), dtype=jnp.float32)
    y2 = jax.block_until_ready(layernorm2(x, w2, b2, layer_norm_type="WithBias"))
    y2_ref = _reference_ln2(x, w2, b2, "WithBias")
    assert jnp.allclose(y2, y2_ref, atol=1e-4, rtol=1e-4), float(jnp.max(jnp.abs(y2 - y2_ref)))

    # Case 3: BiasFree, Restormer-like C=48 with ragged H*W (exercises the partial
    # boundary block — no host-side pad/slice copies anymore).
    B3, C3, H3, W3 = 1, 48, 10, 10
    x3 = jax.random.normal(k4, (B3, C3, H3, W3), dtype=jnp.float32)
    w3 = jnp.ones((C3,), jnp.float32)
    y3 = jax.block_until_ready(layernorm2(x3, w3, layer_norm_type="BiasFree"))
    y3_ref = _reference_ln2(x3, w3, None, "BiasFree")
    assert jnp.allclose(y3, y3_ref, atol=1e-4, rtol=1e-4), float(jnp.max(jnp.abs(y3 - y3_ref)))

    # Case 4: bf16 activations (halves HBM bytes; stats still computed in f32).
    xb = jax.random.normal(k5, (B, C, H, W), dtype=jnp.bfloat16)
    yb = jax.block_until_ready(layernorm2(xb, w2, b2, layer_norm_type="WithBias"))
    yb_ref = _reference_ln2(xb, w2, b2, "WithBias")
    assert yb.dtype == jnp.bfloat16
    assert jnp.allclose(yb.astype(jnp.float32), yb_ref.astype(jnp.float32),
                        atol=3e-2, rtol=3e-2), float(
        jnp.max(jnp.abs(yb.astype(jnp.float32) - yb_ref.astype(jnp.float32))))

    print("KERNEL_OK")
</pallas_src>

<mosaic_0001>
module attributes {stable_mosaic.version = 11 : i64} {
  func.func @kernel(%arg0: i32, %arg1: i32, %arg2: memref<1x4x256xf32, #tpu.memory_space<vmem>>, %arg3: memref<4x1xf32, #tpu.memory_space<vmem>>, %arg4: memref<1x4x256xf32, #tpu.memory_space<vmem>>) attributes {dimension_semantics = [#tpu.dimension_semantics<parallel>, #tpu.dimension_semantics<parallel>], iteration_bounds = array<i64: 2, 1>, scalar_prefetch = 0 : i64, scratch_operands = 0 : i64, tpu.core_type = #tpu.core_type<tc>, window_params = [{transform_indices = @transform_0, window_bounds = array<i64: 1, 4, 256>}, {pipeline_mode = #tpu.pipeline_mode<synchronous>, transform_indices = @transform_1, window_bounds = array<i64: 4, 1>}, {transform_indices = @transform_2, window_bounds = array<i64: 1, 4, 256>}]} {
    %c0 = arith.constant 0 : index
    %c0_0 = arith.constant 0 : index
    %c0_1 = arith.constant 0 : index
    %0 = vector.load %arg2[%c0, %c0_0, %c0_1] : memref<1x4x256xf32, #tpu.memory_space<vmem>>, vector<1x4x256xf32>
    %1 = vector.shape_cast %0 : vector<1x4x256xf32> to vector<4x256xf32>
    %cst = arith.constant dense<0.000000e+00> : vector<256xf32>
    %2 = vector.multi_reduction <add>, %1, %cst [0] : vector<4x256xf32> to vector<256xf32>
    %3 = vector.shape_cast %2 : vector<256xf32> to vector<1x256xf32>
    %cst_2 = arith.constant 2.500000e-01 : f32
    %4 = vector.broadcast %cst_2 : f32 to vector<1x256xf32>
    %5 = arith.mulf %3, %4 : vector<1x256xf32>
    %6 = vector.broadcast %5 : vector<1x256xf32> to vector<4x256xf32>
    %7 = arith.subf %1, %6 : vector<4x256xf32>
    %8 = arith.mulf %7, %7 : vector<4x256xf32>
    %cst_3 = arith.constant dense<0.000000e+00> : vector<256xf32>
    %9 = vector.multi_reduction <add>, %8, %cst_3 [0] : vector<4x256xf32> to vector<256xf32>
    %10 = vector.shape_cast %9 : vector<256xf32> to vector<1x256xf32>
    %cst_4 = arith.constant 2.500000e-01 : f32
    %11 = vector.broadcast %cst_4 : f32 to vector<1x256xf32>
    %12 = arith.mulf %10, %11 : vector<1x256xf32>
    %cst_5 = arith.constant 9.99999974E-6 : f32
    %13 = vector.broadcast %cst_5 : f32 to vector<1x256xf32>
    %14 = arith.addf %12, %13 : vector<1x256xf32>
    %15 = math.rsqrt %14 : vector<1x256xf32>
    %c0_6 = arith.constant 0 : index
    %c0_7 = arith.constant 0 : index
    %16 = vector.load %arg3[%c0_6, %c0_7] : memref<4x1xf32, #tpu.memory_space<vmem>>, vector<4x1xf32>
    %17 = vector.broadcast %15 : vector<1x256xf32> to vector<4x256xf32>
    %18 = vector.broadcast %16 : vector<4x1xf32> to vector<4x256xf32>
    %19 = arith.mulf %17, %18 : vector<4x256xf32>
    %20 = arith.mulf %1, %19 : vector<4x256xf32>
    %c0_8 = arith.constant 0 : index
    %c0_9 = arith.constant 0 : index
    %c0_10 = arith.constant 0 : index
    %21 = vector.load %arg4[%c0_8, %c0_9, %c0_10] : memref<1x4x256xf32, #tpu.memory_space<vmem>>, vector<1x4x256xf32>
    %22 = vector.shape_cast %21 : vector<1x4x256xf32> to vector<4x256xf32>
    %23 = vector.shape_cast %20 : vector<4x256xf32> to vector<1x4x256xf32>
    tpu.vector_store %arg4[%c0_8, %c0_9, %c0_10], %23 {strides = array<i32>} : memref<1x4x256xf32, #tpu.memory_space<vmem>>, vector<1x4x256xf32>,
    return
  }
  func.func @transform_0(%arg0: i32, %arg1: i32) -> (i32, i32, i32) {
    %c0_i32 = arith.constant 0 : i32
    %c0_i32_0 = arith.constant 0 : i32
    return %arg0, %c0_i32, %arg1 : i32, i32, i32
  }
  func.func @transform_1(%arg0: i32, %arg1: i32) -> (i32, i32) {
    %c0_i32 = arith.constant 0 : i32
    %c0_i32_0 = arith.constant 0 : i32
    %c0_i32_1 = arith.constant 0 : i32
    return %c0_i32, %c0_i32_0 : i32, i32
  }
  func.func @transform_2(%arg0: i32, %arg1: i32) -> (i32, i32, i32) {
    %c0_i32 = arith.constant 0 : i32
    %c0_i32_0 = arith.constant 0 : i32
    return %arg0, %c0_i32, %arg1 : i32, i32, i32
  }
}

</mosaic_0001>

<bundles_post_ra>
// kernel: tpu_custom_call.1
= control target key start
LH: loop header
LB: loop body
LE: loop exit
PB: predicated region body
PF: predicated region fallthrough
CT: control target
= control target key end

     0   :  { %7 = vsyncpa [#allocation3], 0  ;;  %s746_s0 = inlined_call_operand.hbm [shape: f32[2,4,256], index: 0, kind: input, shape index: {}]   ;;  %s747_s1 = inlined_call_operand.vmem [shape: f32[4,1], index: 1, kind: input, shape index: {}]   ;;  %s748_s2 = inlined_call_operand.hbm [shape: f32[2,4,256], index: 2, kind: output, shape index: {}]  }
   0x1   :  { %9 = vsyncpa [#allocation3 + $0x1], 0 }
   0x2   :  { %10 = vsyncpa [#allocation4], 0 }
   0x3   :  { %12 = vsyncpa [#allocation4 + $0x1], 0  ;;  %s563_s9 = smov 0   ;;  %s565_s10 = smov 0  }
   0x4   :  { %s567_s11 = smov 0   ;;  %s569_s12 = smov 0  }
   0x5   :  { %s571_s13 = smov 0   ;;  %s573_s14 = smov 0  }
   0x6 LB: > { %s345_s15 = sadd.s32 4294967295, %s543_s14   ;;  %s346_s16 = sadd.s32 4294967294, %s543_s14   ;;  %s543_s14 = sphi %s573_s14, %s18_s14   ;;  %s539_s13 = sphi %s571_s13, %s764_s13   ;;  %s535_s12 = sphi %s569_s12, %s763_s12   ;;  %s531_s11 = sphi %s567_s11, %s762_s11   ;;  %s527_s10 = sphi %s565_s10, %s761_s10   ;;  %s523_s9 = sphi %s563_s9, %s760_s9  }
   0x7   : > { %s30_s17 = sadd.s32 1, %s539_s13  ;;  %s39_s18 = sadd.s32 1, %s531_s11 }
   0x8   : > { %p32_p0 = scmp.ge.s32.totalorder %s30_s17, 2  ;;  %p46_p1 = scmp.ne.s32.totalorder %s531_s11, %s527_s10 }
   0x9   : > { %p47_p2 = scmp.eq.s32.totalorder %s543_s14, 0  ;;  %p52_p3 = scmp.ne.s32.totalorder %s527_s10, %s523_s9 }
   0xa   : > { %s766_s17 = smov (%p32_p0, %s30_s17), 0  ;;  %p53_p5 = scmp.eq.s32.totalorder %s345_s15, 0 }
   0xb   : > { %p604_p4 = por %p47_p2, %p46_p1  ;;  %s34_s20 = ssub.s32 %s539_s13, %s766_s17 }
   0xc   : > { %p99_p6 = scmp.eq.s32.totalorder %s345_s15, 1  ;;  %p37_p7 = scmp.eq.s32.totalorder %s34_s20, 0 }
   0xd   : > { %p610_p8 = por %p53_p5, %p52_p3  ;;  %p105_p10 = scmp.eq.s32.totalorder %s346_s16, 1 }
   0xe   : > { %p614_p9 = por %p99_p6, %p46_p1  ;;  %p374_p13 = scmp.lt.s32.totalorder %s543_s14, 2 }
   0xf   : > { %s619_s23 = scalar_select %p37_p7, %s531_s11, %s39_s18  }
  0x10   : > { %s752_s22 = scalar_select %p614_p9, 1, 0 }
  0x11   : > { %p621_p11 = por %p105_p10, %p52_p3  ;;  %s128_s25 = sand.u32 1, %s531_s11  }
  0x12   : > { %s349_s26 = sshll.u32 %s128_s25, 3  ;;  %s360_s27 = sshll.u32 %s539_s13, 7 }
  0x13   : > { %s753_s24 = scalar_select %p621_p11, 1, 0 }
  0x14   : > { %s632_s30 = scalar_lea.hbm %s746_s0, %s360_s27  ;;  %s132_s3 = scalar_lea.vmem [#allocation2], %s349_s26 }
  0x15   : > { %s142_s4 = sshll.u32 %s132_s3, 4  ;;  %p638_p0 = pnand %p374_p13, %p604_p4  ;;  %s634_s4 = int_to_ptr.vmem [resolvable:$true] %s142_s4 }
  0x16   : > { %s129_s6 = scalar_lea.sflag [#allocation3], %s128_s25  ;;  %s431_s7 = scalar_lea.hbm %s632_s30, 128 }
  0x17   : > { %p432_p3 = scmp.ne.s32.totalorder %s632_s30, %s431_s7  ;;  %p433_p5 = pneg %p638_p0 }
  0x18   : > { %s436_s16 = scalar_lea.hbm %s746_s0, 256  ;;  %p437_p4 = scmp.lt.u32.totalorder %s632_s30, %s746_s0 }
  0x19   : > { %p434_p6 = pnand %p433_p5, %p432_p3  ;;  %p438_p10 = scmp.lt.u32.totalorder %s436_s16, %s431_s7 }
  0x1a   : > { %p440_p12 = scmp.lt.u32.totalorder %s431_s7, %s632_s30 }
  0x1b   : > { %p435_p7 = pneg %p434_p6  ;;  %p439_p13 = por %p438_p10, %p437_p4 }
  0x1d   : > { %p441_p1 = por %p440_p12, %p439_p13 }
  0x1f   : > { %p442_p2 = pnand %p441_p1, %p435_p7 }
  0x21   : > { %445 = shalt.err (!%p442_p2)
}
  0x22   : > { %s446_s20 = scalar_lea.vmem %s634_s4, 128  ;;  %s545_s25 = smov [#allocation2]  }
  0x23   : > { %p447_p3 = scmp.ne.s32.totalorder %s634_s4, %s446_s20  ;;  %s451_s26 = sshll.u32 %s545_s25, 4  ;;  %s452_s26 = int_to_ptr.vmem [resolvable:$false] %s451_s26 }
  0x24   : > { %s453_s27 = scalar_lea.vmem %s452_s26, 256  ;;  %p454_p9 = scmp.lt.s32.totalorder %s634_s4, %s452_s26 }
  0x25   : > { %p449_p6 = pnand %p447_p3, %p433_p5  ;;  %p455_p4 = scmp.lt.s32.totalorder %s453_s27, %s446_s20 }
  0x27   : > { %p450_p11 = pneg %p449_p6  ;;  %p456_p10 = por %p455_p4, %p454_p9 }
  0x29   : > { %p457_p12 = pnand %p456_p10, %p450_p11 }
  0x2b   : > { %460 = shalt.err (!%p457_p12)
}
  0x2c   : > { %369 = dma.hbm_to_vmem [thread:$0]  (!%p638_p0), %s632_s30, 128, %s634_s4, %s129_s6  }
  0x2d   : > { %p755_p1 = scmp.lt.s32.totalorder %s543_s14, 3  ;;  %p756_p2 = scmp.ge.s32.totalorder %s543_s14, 1 }
  0x2f   : > { %p148_p5 = pnand %p756_p2, %p755_p1 }
  0x30   : > { %s674_s28 = sand.u32 (!%p148_p5), 1, %s527_s10  }
  0x31   : > { %151 = sbr.rel (%p148_p5) target bundleno = 207 (0xcf), region = 28  ;;  %s353_s29 = sshll.u32 (!%p148_p5), %s674_s28, 3 }
  0x32   : > { %s154_s3 = scalar_lea.sflag (!%p148_p5), [#allocation3], %s674_s28  ;;  %s157_s5 = scalar_lea.vmem (!%p148_p5), [#allocation2], %s353_s29 }
  0x38   : > { %514 = dma.done.wait (%p610_p8), %s154_s3, 128  }
  0x39   : > { %516 = vsyncadd (%p610_p8), %s154_s3, 4294967168  ;;  %v546_v0 = vmov 0   ;;  %v230_v1 = vld [vmem:[%s747_s1] sm:$0xf]  ;;  %vm184_vm0 = vcmask 1043456   ;;  %s361_s21 = sshll.u32 %s535_s12, 7 }
  0x3a   : > { %425 = vset.pattern.permute.xlu0 %v546_v0  ;;  %v180_v2 = vld [vmem:[%s157_s5] sm:$0xff]  ;;  %s177_s6 = scalar_lea.vmem [#allocation5], %s353_s29  ;;  %s697_s16 = scalar_lea.hbm %s748_s2, %s361_s21 }
  0x3b   : > { %233 = vperm.xlu0 %425, %v230_v1   ;;  %v182_v3 = vcombine.high %v180_v2, %v180_v2  ;;  %v185_v4 = vsel %vm184_vm0, %v180_v2, 0.0  ;;  %s261_s7 = sshll.u32 %s177_s6, 4  ;;  %s245_s18 = scalar_lea.sflag [#allocation4], %s674_s28  ;;  %s699_s7 = int_to_ptr.vmem [resolvable:$true] %s261_s7 }
  0x3c   : > { %v186_v6 = vrot.slane %v185_v4, 4  ;;  %s461_s19 = scalar_lea.vmem %s699_s7, 128  ;;  %p757_p9 = scmp.ne.s32.totalorder %s752_s22, 0 }
  0x3d   : > { %v192_v5 = vsel %vm184_vm0, %v182_v3, 0.0  ;;  %p462_p8 = scmp.ne.s32.totalorder %s699_s7, %s461_s19  ;;  %s547_s12 = smov [#allocation5]  }
  0x3e   : > { %v193_v7 = vrot.slane %v192_v5, 4  ;;  %v187_v8 = vadd.f32 %v186_v6, %v185_v4  ;;  %s465_s20 = sshll.u32 %s547_s12, 4  ;;  %s466_s20 = int_to_ptr.vmem [resolvable:$false] %s465_s20 }
  0x3f   : > { %p463_p11 = pnand %p462_p8, %p757_p9  ;;  %s467_s25 = scalar_lea.vmem %s466_s20, 256 }
  0x40   : > { %v194_v9 = vadd.f32 %v193_v7, %v192_v5  ;;  %v188_v10 = vrot.slane %v187_v8, 2  ;;  %p468_p7 = scmp.lt.s32.totalorder %s699_s7, %s466_s20  ;;  %p469_p13 = scmp.lt.s32.totalorder %s467_s25, %s461_s19 }
  0x41   : > { %p464_p0 = pneg %p463_p11 }
  0x42   : > { %v195_v11 = vrot.slane %v194_v9, 2  ;;  %v189_v12 = vadd.f32 %v188_v10, %v187_v8  ;;  %p470_p3 = por %p469_p13, %p468_p7 }
  0x44   : > { %v196_v13 = vadd.f32 %v195_v11, %v194_v9  ;;  %v190_v14 = vrot.slane %v189_v12, 1  ;;  %p471_p6 = pnand %p470_p3, %p464_p0 }
  0x46   : > { %v197_v15 = vrot.slane %v196_v13, 1  ;;  %v191_v16 = vadd.f32 %v190_v14, %v189_v12 }
  0x48   : > { %v198_v17 = vadd.f32 %v197_v15, %v196_v13  ;;  %v199_v18 = vmul.f32 0.25, %v191_v16 }
  0x4a   : > { %v200_v19 = vmul.f32 0.25, %v198_v17 }
  0x4c   : > { %v203_v20 = vcombine.low %v199_v18, %v200_v19 }
  0x4e   : > { %v205_v21 = vsub.f32 %v180_v2, %v203_v20 }
  0x50   : > { %v206_v22 = vmul.f32 %v205_v21, %v205_v21 }
  0x52   : > { %v208_v23 = vcombine.high %v206_v22, %v206_v22  ;;  %v210_v24 = vsel %vm184_vm0, %v206_v22, 0.0 }
  0x53   : > { %v211_v26 = vrot.slane %v210_v24, 4 }
  0x54   : > { %v217_v25 = vsel %vm184_vm0, %v208_v23, 0.0 }
  0x55   : > { %v218_v27 = vrot.slane %v217_v25, 4  ;;  %v212_v28 = vadd.f32 %v211_v26, %v210_v24 }
  0x57   : > { %v219_v29 = vadd.f32 %v218_v27, %v217_v25  ;;  %v213_v30 = vrot.slane %v212_v28, 2 }
  0x59   : > { %v220_v31 = vrot.slane %v219_v29, 2  ;;  %v214_v32 = vadd.f32 %v213_v30, %v212_v28 }
  0x5b   : > { %v221_v33 = vadd.f32 %v220_v31, %v219_v29  ;;  %v215_v34 = vrot.slane %v214_v32, 1 }
  0x5d   : > { %v222_v35 = vrot.slane %v221_v33, 1  ;;  %v216_v36 = vadd.f32 %v215_v34, %v214_v32 }
  0x5f   : > { %v223_v37 = vadd.f32 %v222_v35, %v221_v33  ;;  %v224_v38 = vmul.f32 0.25, %v216_v36 }
  0x61   : > { %v225_v39 = vmul.f32 0.25, %v223_v37  ;;  %v226_v40 = vadd.f32 1e-05, %v224_v38 }
  0x63   : > { %v227_v41 = vadd.f32 1e-05, %v225_v39  ;;  %427 = vrsqrt.f32 %v226_v40 }
  0x65   : > { %429 = vrsqrt.f32 %v227_v41 }
  0x6d   : > { %v428_v42 = vpop.eup %427 }
  0x6f   : > { %v430_v43 = vpop.eup %429 }
  0xba   : > { %v234_v44 = vpop.permute.xlu0 %233 }
  0xbb   : > { %v236_v45 = vmul.f32 %v428_v42, %v234_v44  ;;  %v237_v46 = vmul.f32 %v430_v43, %v234_v44 }
  0xbd   : > { %v240_v47 = vcombine.low %v236_v45, %v237_v46 }
  0xbf   : > { %v242_v48 = vmul.f32 %v240_v47, %v180_v2 }
  0xc1   : > { %243 = vst [vmem:[%s177_s6] sm:$0xff] %v242_v48 }
  0xc2   : > { %474 = shalt.err (!%p471_p6)
}
  0xc3   : > { %s475_s26 = scalar_lea.hbm %s697_s16, 128  ;;  %s479_s29 = scalar_lea.hbm %s748_s2, 256 }
  0xc4   : > { %p476_p4 = scmp.ne.s32.totalorder %s697_s16, %s475_s26  ;;  %p480_p1 = scmp.lt.u32.totalorder %s697_s16, %s748_s2 }
  0xc5   : > { %p481_p2 = scmp.lt.u32.totalorder %s479_s29, %s475_s26  ;;  %p483_p8 = scmp.lt.u32.totalorder %s475_s26, %s697_s16 }
  0xc6   : > { %p477_p10 = pnand %p476_p4, %p757_p9 }
  0xc7   : > { %p482_p5 = por %p481_p2, %p480_p1 }
  0xc8   : > { %p478_p12 = pneg %p477_p10 }
  0xc9   : > { %p484_p11 = por %p483_p8, %p482_p5 }
  0xcb   : > { %p485_p0 = pnand %p484_p11, %p478_p12 }
  0xcd   : > { %488 = shalt.err (!%p485_p0)
}
  0xce   : > { %364 = dma.vmem_to_hbm [thread:$0]  (%p757_p9), %s699_s7, 128, %s697_s16, %s245_s18  }
  0xcf PF: > { %s273_s30 = sand.u32 1, %s523_s9   ;;  %p758_p7 = scmp.ne.s32.totalorder %s753_s24, 0 }
  0xd0   : > { %p759_p13 = scmp.ge.s32.totalorder %s543_s14, 2  ;;  %s274_s4 = scalar_lea.sflag [#allocation4], %s273_s30 }
  0xd2   : > { %p371_p3 = pnand %p759_p13, %p758_p7 }
  0xd4   : > { %518 = dma.done.wait (!%p371_p3), %s274_s4, 128  }
  0xd5   : > { %520 = vsyncadd (!%p371_p3), %s274_s4, 4294967168  ;;  %s18_s14 = sadd.s32 1, %s543_s14   ;;  %s760_s9 = smov %s527_s10 }
  0xd6   : > { %p15_p6 = scmp.ge.s32.totalorder %s18_s14, 4   ;;  %s761_s10 = smov %s531_s11 }
  0xd7   : > { %s762_s11 = smov %s619_s23  ;;  %s763_s12 = smov %s539_s13 }
  0xd8   : > { %s764_s13 = smov %s766_s17  ;;  %17 = sbr.rel (!%p15_p6) target bundleno = 6 (0x6), region = 73 }
  0xdf   :  { %279 = vsyncpa [#allocation3], 1 }
  0xe0   :  { %281 = vsyncpa [#allocation3 + $0x1], 1 }
  0xe1   :  { %282 = vsyncpa [#allocation4], 1 }
  0xe2   :  { %284 = vsyncpa [#allocation4 + $0x1], 1 }

</bundles_post_ra>
